<compile_context>
chip_gen: v7x
topology: tpu7x:2x2x1
jax: 0.10.0
libtpu: 0.0.40
codegen_flags: <defaults>
</compile_context>

<pallas_src>
import math

import jax
import jax.numpy as jnp
from jax.experimental import pallas as pl
from jax.experimental.pallas import tpu as pltpu

Z_DIM = 128
W_DIM = 128
N_LAYERS = 8  # 8 WSLinear layers, ReLU after the first 7


def _round_up(n, m):
    return ((n + m - 1) // m) * m


def _choose_tile_b(B, target=2048, min_tiles=1):
    """Pick a batch tile: multiple of 8, <= target, minimizing padding waste."""
    b8 = _round_up(max(B, 1), 8)
    n_tiles = max(min_tiles, -(-b8 // target))          # ceil(b8 / target)
    return _round_up(-(-b8 // n_tiles), 8)               # ceil(b8 / n_tiles) -> mult of 8


def mapping_kernel(x_ref, w_ref, b_ref, out_ref):
    """One batch tile through the whole mapping network.

    x_ref:  (TILE_B, Z_DIM)            activation tile (f32 in HBM)
    w_ref:  (N_LAYERS, IN, OUT)        pre-transposed, scale-folded weights (resident, bf16/f32)
    b_ref:  (N_LAYERS, OUT)            biases (resident, f32)
    out_ref:(TILE_B, W_DIM)
    """
    # --- PixelNorm over the feature axis (torch dim=1), in f32 on VPU/EUP ---
    x = x_ref[...].astype(jnp.float32)
    x = x * jax.lax.rsqrt(jnp.mean(x * x, axis=-1, keepdims=True) + 1e-8)

    mm_dtype = w_ref.dtype  # bf16 by default: MXU-native on all generations
    for i in range(N_LAYERS):
        # Only the matmul operands are cast to the compute dtype; accumulation,
        # bias add and ReLU stay in f32.
        y = jnp.dot(x.astype(mm_dtype), w_ref[i], preferred_element_type=jnp.float32)
        y = y + b_ref[i]
        if i < N_LAYERS - 1:
            y = jnp.maximum(y, 0.0)                      # ReLU
        x = y

    out_ref[...] = x.astype(out_ref.dtype)


def prepare_mapping_params(weights, biases, compute_dtype=jnp.bfloat16):
    """One-time weight prep (call OUTSIDE the hot path).

    weights[i]: (out, in) torch layout; biases[i]: (1, out).
    Returns:
      w_stack: (N_LAYERS, in, out) with sqrt(2/in) equalized-LR scale folded in,
               cast to compute_dtype (bf16 by default).
      b_stack: (N_LAYERS, out) in f32.
    """
    n = len(weights)
    in_dims = [w.shape[1] for w in weights]
    w_stack = jnp.stack(
        [(weights[i].astype(jnp.float32).T * math.sqrt(2.0 / in_dims[i])).astype(compute_dtype)
         for i in range(n)]
    )
    b_stack = jnp.stack([biases[i].astype(jnp.float32).reshape(-1) for i in range(n)])
    return w_stack, b_stack


def mapping_network(x, w_stack, b_stack, *, tile_b=None, target_tile_b=2048, min_tiles=1):
    """x: (B, Z_DIM) f32; w_stack/b_stack from prepare_mapping_params()."""
    B = x.shape[0]
    n_layers, z_dim, w_dim = w_stack.shape

    if tile_b is None:
        tile_b = _choose_tile_b(B, target=target_tile_b, min_tiles=min_tiles)
    b_pad = pl.cdiv(B, tile_b) * tile_b
    if b_pad != B:
        # Zero rows are harmless: PixelNorm maps them to 0 (eps=1e-8) and their
        # downstream values are sliced off below.
        x = jnp.pad(x, ((0, b_pad - B), (0, 0)))

    grid = (b_pad // tile_b,)

    flops = 2 * b_pad * z_dim * w_dim * n_layers
    bytes_accessed = (
        b_pad * z_dim * x.dtype.itemsize            # activations in
        + b_pad * w_dim * x.dtype.itemsize          # activations out
        + w_stack.size * w_stack.dtype.itemsize     # resident weights (once)
        + b_stack.size * b_stack.dtype.itemsize     # resident biases (once)
    )

    out = pl.pallas_call(
        mapping_kernel,
        out_shape=jax.ShapeDtypeStruct((b_pad, w_dim), x.dtype),
        grid=grid,
        in_specs=[
            # Activations: tiled over the batch grid (pipelined/double-buffered).
            pl.BlockSpec((tile_b, z_dim), lambda i: (i, 0)),
            # Weights/biases: constant index_map -> fetched once, VMEM resident.
            pl.BlockSpec((n_layers, z_dim, w_dim), lambda i: (0, 0, 0)),
            pl.BlockSpec((n_layers, w_dim), lambda i: (0, 0)),
        ],
        out_specs=pl.BlockSpec((tile_b, w_dim), lambda i: (i, 0)),
        compiler_params=pltpu.CompilerParams(
            dimension_semantics=("parallel",),
        ),
        cost_estimate=pl.CostEstimate(
            flops=flops, transcendentals=b_pad, bytes_accessed=bytes_accessed
        ),
    )(x, w_stack, b_stack)

    return out[:B] if b_pad != B else out


def mapping_network_ref(x, weights, biases):
    """Pure-JAX f32 reference mirroring the PyTorch module."""
    x = x.astype(jnp.float32)
    x = x * jax.lax.rsqrt(jnp.mean(x * x, axis=-1, keepdims=True) + 1e-8)
    n = len(weights)
    for i in range(n):
        scale = math.sqrt(2.0 / weights[i].shape[1])
        x = (x * scale) @ weights[i].astype(jnp.float32).T + biases[i].astype(jnp.float32)
        if i < n - 1:
            x = jnp.maximum(x, 0.0)
    return x


if __name__ == "__main__":
    key = jax.random.PRNGKey(0)
    kx, *kws = jax.random.split(key, 1 + 2 * N_LAYERS)

    in_dims = [Z_DIM] + [W_DIM] * (N_LAYERS - 1)
    weights = []
    biases = []
    for i in range(N_LAYERS):
        w = jax.random.normal(kws[2 * i], (W_DIM, in_dims[i]), dtype=jnp.float32)
        b = 0.1 * jax.random.normal(kws[2 * i + 1], (1, W_DIM), dtype=jnp.float32)
        weights.append(w)
        biases.append(b)

    # One-time parameter prep (hoisted out of the hot path).
    w_bf16, b_f32 = prepare_mapping_params(weights, biases, compute_dtype=jnp.bfloat16)
    w_f32, _ = prepare_mapping_params(weights, biases, compute_dtype=jnp.float32)

    # --- Test 1: f32 compute path, tight tolerance (semantic correctness) ---
    batch = 8
    x = jax.random.normal(kx, (batch, Z_DIM), dtype=jnp.float32)
    ref = mapping_network_ref(x, weights, biases)
    out_f32 = jax.block_until_ready(mapping_network(x, w_f32, b_f32))
    assert out_f32.shape == (batch, W_DIM)
    assert jnp.allclose(out_f32, ref, rtol=1e-4, atol=1e-4), "f32 path mismatch vs reference"

    # --- Test 2: default bf16 MXU path, looser tolerance (expected precision) ---
    out_bf16 = jax.block_until_ready(mapping_network(x, w_bf16, b_f32))
    assert out_bf16.shape == (batch, W_DIM)
    assert jnp.allclose(out_bf16, ref, rtol=5e-2, atol=1e-1), "bf16 path mismatch vs reference"
    rel_l2 = jnp.linalg.norm(out_bf16 - ref) / jnp.linalg.norm(ref)
    assert rel_l2 < 3e-2, f"bf16 path relative L2 error too large: {rel_l2}"

    # --- Test 3: ragged batch exercising the multi-step grid + padding path ---
    batch2 = 20
    x2 = jax.random.normal(jax.random.PRNGKey(1), (batch2, Z_DIM), dtype=jnp.float32)
    ref2 = mapping_network_ref(x2, weights, biases)
    out2 = jax.block_until_ready(mapping_network(x2, w_bf16, b_f32, tile_b=8))
    assert out2.shape == (batch2, W_DIM)
    assert jnp.allclose(out2, ref2, rtol=5e-2, atol=1e-1), "bf16 ragged-batch mismatch vs reference"

    print("KERNEL_OK")
</pallas_src>

<mosaic_0001>
module attributes {stable_mosaic.version = 11 : i64} {
  func.func @mapping_kernel(%arg0: i32, %arg1: memref<8x128xf32, #tpu.memory_space<vmem>>, %arg2: memref<8x128x128xf32, #tpu.memory_space<vmem>>, %arg3: memref<8x128xf32, #tpu.memory_space<vmem>>, %arg4: memref<8x128xf32, #tpu.memory_space<vmem>>) attributes {dimension_semantics = [#tpu.dimension_semantics<parallel>], iteration_bounds = array<i64: 1>, scalar_prefetch = 0 : i64, scratch_operands = 0 : i64, tpu.core_type = #tpu.core_type<tc>, window_params = [{transform_indices = @transform_0, window_bounds = array<i64: 8, 128>}, {pipeline_mode = #tpu.pipeline_mode<synchronous>, transform_indices = @transform_1, window_bounds = array<i64: 8, 128, 128>}, {pipeline_mode = #tpu.pipeline_mode<synchronous>, transform_indices = @transform_2, window_bounds = array<i64: 8, 128>}, {transform_indices = @transform_3, window_bounds = array<i64: 8, 128>}]} {
    %c0 = arith.constant 0 : index
    %c0_0 = arith.constant 0 : index
    %0 = vector.load %arg1[%c0, %c0_0] : memref<8x128xf32, #tpu.memory_space<vmem>>, vector<8x128xf32>
    %1 = arith.mulf %0, %0 : vector<8x128xf32>
    %cst = arith.constant dense<0.000000e+00> : vector<8xf32>
    %2 = vector.multi_reduction <add>, %1, %cst [1] : vector<8x128xf32> to vector<8xf32>
    %3 = vector.shape_cast %2 : vector<8xf32> to vector<8x1xf32>
    %cst_1 = arith.constant 1.280000e+02 : f32
    %4 = vector.broadcast %cst_1 : f32 to vector<8x1xf32>
    %5 = arith.divf %3, %4 : vector<8x1xf32>
    %cst_2 = arith.constant 9.99999993E-9 : f32
    %6 = vector.broadcast %cst_2 : f32 to vector<8x1xf32>
    %7 = arith.addf %5, %6 : vector<8x1xf32>
    %8 = math.rsqrt %7 : vector<8x1xf32>
    %9 = vector.broadcast %8 : vector<8x1xf32> to vector<8x128xf32>
    %10 = arith.mulf %0, %9 : vector<8x128xf32>
    %c0_3 = arith.constant 0 : index
    %c0_4 = arith.constant 0 : index
    %c0_5 = arith.constant 0 : index
    %11 = vector.load %arg2[%c0_3, %c0_4, %c0_5] : memref<8x128x128xf32, #tpu.memory_space<vmem>>, vector<1x128x128xf32>
    %12 = vector.shape_cast %11 : vector<1x128x128xf32> to vector<128x128xf32>
    %cst_6 = arith.constant dense<0.000000e+00> : vector<8x128xf32>
    %13 = tpu.matmul %10, %12, %cst_6 {dimension_numbers = #tpu.dot_dimension_numbers<[1], [0], [0], [1], [0, 0, 1, 1], [], []>} : vector<8x128xf32>, vector<128x128xf32>, vector<8x128xf32> -> vector<8x128xf32>
    %c0_7 = arith.constant 0 : index
    %c0_8 = arith.constant 0 : index
    %14 = vector.load %arg3[%c0_7, %c0_8] : memref<8x128xf32, #tpu.memory_space<vmem>>, vector<1x128xf32>
    %15 = vector.shape_cast %14 : vector<1x128xf32> to vector<128xf32>
    %16 = vector.shape_cast %15 : vector<128xf32> to vector<1x128xf32>
    %17 = vector.broadcast %16 : vector<1x128xf32> to vector<8x128xf32>
    %18 = arith.addf %13, %17 : vector<8x128xf32>
    %cst_9 = arith.constant 0.000000e+00 : f32
    %19 = vector.broadcast %cst_9 : f32 to vector<8x128xf32>
    %20 = arith.maximumf %18, %19 : vector<8x128xf32>
    %c1 = arith.constant 1 : index
    %c0_10 = arith.constant 0 : index
    %c0_11 = arith.constant 0 : index
    %21 = vector.load %arg2[%c1, %c0_10, %c0_11] : memref<8x128x128xf32, #tpu.memory_space<vmem>>, vector<1x128x128xf32>
    %22 = vector.shape_cast %21 : vector<1x128x128xf32> to vector<128x128xf32>
    %cst_12 = arith.constant dense<0.000000e+00> : vector<8x128xf32>
    %23 = tpu.matmul %20, %22, %cst_12 {dimension_numbers = #tpu.dot_dimension_numbers<[1], [0], [0], [1], [0, 0, 1, 1], [], []>} : vector<8x128xf32>, vector<128x128xf32>, vector<8x128xf32> -> vector<8x128xf32>
    %c1_13 = arith.constant 1 : index
    %c0_14 = arith.constant 0 : index
    %24 = vector.load %arg3[%c1_13, %c0_14] : memref<8x128xf32, #tpu.memory_space<vmem>>, vector<1x128xf32>
    %25 = vector.shape_cast %24 : vector<1x128xf32> to vector<128xf32>
    %26 = vector.shape_cast %25 : vector<128xf32> to vector<1x128xf32>
    %27 = vector.broadcast %26 : vector<1x128xf32> to vector<8x128xf32>
    %28 = arith.addf %23, %27 : vector<8x128xf32>
    %cst_15 = arith.constant 0.000000e+00 : f32
    %29 = vector.broadcast %cst_15 : f32 to vector<8x128xf32>
    %30 = arith.maximumf %28, %29 : vector<8x128xf32>
    %c2 = arith.constant 2 : index
    %c0_16 = arith.constant 0 : index
    %c0_17 = arith.constant 0 : index
    %31 = vector.load %arg2[%c2, %c0_16, %c0_17] : memref<8x128x128xf32, #tpu.memory_space<vmem>>, vector<1x128x128xf32>
    %32 = vector.shape_cast %31 : vector<1x128x128xf32> to vector<128x128xf32>
    %cst_18 = arith.constant dense<0.000000e+00> : vector<8x128xf32>
    %33 = tpu.matmul %30, %32, %cst_18 {dimension_numbers = #tpu.dot_dimension_numbers<[1], [0], [0], [1], [0, 0, 1, 1], [], []>} : vector<8x128xf32>, vector<128x128xf32>, vector<8x128xf32> -> vector<8x128xf32>
    %c2_19 = arith.constant 2 : index
    %c0_20 = arith.constant 0 : index
    %34 = vector.load %arg3[%c2_19, %c0_20] : memref<8x128xf32, #tpu.memory_space<vmem>>, vector<1x128xf32>
    %35 = vector.shape_cast %34 : vector<1x128xf32> to vector<128xf32>
    %36 = vector.shape_cast %35 : vector<128xf32> to vector<1x128xf32>
    %37 = vector.broadcast %36 : vector<1x128xf32> to vector<8x128xf32>
    %38 = arith.addf %33, %37 : vector<8x128xf32>
    %cst_21 = arith.constant 0.000000e+00 : f32
    %39 = vector.broadcast %cst_21 : f32 to vector<8x128xf32>
    %40 = arith.maximumf %38, %39 : vector<8x128xf32>
    %c3 = arith.constant 3 : index
    %c0_22 = arith.constant 0 : index
    %c0_23 = arith.constant 0 : index
    %41 = vector.load %arg2[%c3, %c0_22, %c0_23] : memref<8x128x128xf32, #tpu.memory_space<vmem>>, vector<1x128x128xf32>
    %42 = vector.shape_cast %41 : vector<1x128x128xf32> to vector<128x128xf32>
    %cst_24 = arith.constant dense<0.000000e+00> : vector<8x128xf32>
    %43 = tpu.matmul %40, %42, %cst_24 {dimension_numbers = #tpu.dot_dimension_numbers<[1], [0], [0], [1], [0, 0, 1, 1], [], []>} : vector<8x128xf32>, vector<128x128xf32>, vector<8x128xf32> -> vector<8x128xf32>
    %c3_25 = arith.constant 3 : index
    %c0_26 = arith.constant 0 : index
    %44 = vector.load %arg3[%c3_25, %c0_26] : memref<8x128xf32, #tpu.memory_space<vmem>>, vector<1x128xf32>
    %45 = vector.shape_cast %44 : vector<1x128xf32> to vector<128xf32>
    %46 = vector.shape_cast %45 : vector<128xf32> to vector<1x128xf32>
    %47 = vector.broadcast %46 : vector<1x128xf32> to vector<8x128xf32>
    %48 = arith.addf %43, %47 : vector<8x128xf32>
    %cst_27 = arith.constant 0.000000e+00 : f32
    %49 = vector.broadcast %cst_27 : f32 to vector<8x128xf32>
    %50 = arith.maximumf %48, %49 : vector<8x128xf32>
    %c4 = arith.constant 4 : index
    %c0_28 = arith.constant 0 : index
    %c0_29 = arith.constant 0 : index
    %51 = vector.load %arg2[%c4, %c0_28, %c0_29] : memref<8x128x128xf32, #tpu.memory_space<vmem>>, vector<1x128x128xf32>
    %52 = vector.shape_cast %51 : vector<1x128x128xf32> to vector<128x128xf32>
    %cst_30 = arith.constant dense<0.000000e+00> : vector<8x128xf32>
    %53 = tpu.matmul %50, %52, %cst_30 {dimension_numbers = #tpu.dot_dimension_numbers<[1], [0], [0], [1], [0, 0, 1, 1], [], []>} : vector<8x128xf32>, vector<128x128xf32>, vector<8x128xf32> -> vector<8x128xf32>
    %c4_31 = arith.constant 4 : index
    %c0_32 = arith.constant 0 : index
    %54 = vector.load %arg3[%c4_31, %c0_32] : memref<8x128xf32, #tpu.memory_space<vmem>>, vector<1x128xf32>
    %55 = vector.shape_cast %54 : vector<1x128xf32> to vector<128xf32>
    %56 = vector.shape_cast %55 : vector<128xf32> to vector<1x128xf32>
    %57 = vector.broadcast %56 : vector<1x128xf32> to vector<8x128xf32>
    %58 = arith.addf %53, %57 : vector<8x128xf32>
    %cst_33 = arith.constant 0.000000e+00 : f32
    %59 = vector.broadcast %cst_33 : f32 to vector<8x128xf32>
    %60 = arith.maximumf %58, %59 : vector<8x128xf32>
    %c5 = arith.constant 5 : index
    %c0_34 = arith.constant 0 : index
    %c0_35 = arith.constant 0 : index
    %61 = vector.load %arg2[%c5, %c0_34, %c0_35] : memref<8x128x128xf32, #tpu.memory_space<vmem>>, vector<1x128x128xf32>
    %62 = vector.shape_cast %61 : vector<1x128x128xf32> to vector<128x128xf32>
    %cst_36 = arith.constant dense<0.000000e+00> : vector<8x128xf32>
    %63 = tpu.matmul %60, %62, %cst_36 {dimension_numbers = #tpu.dot_dimension_numbers<[1], [0], [0], [1], [0, 0, 1, 1], [], []>} : vector<8x128xf32>, vector<128x128xf32>, vector<8x128xf32> -> vector<8x128xf32>
    %c5_37 = arith.constant 5 : index
    %c0_38 = arith.constant 0 : index
    %64 = vector.load %arg3[%c5_37, %c0_38] : memref<8x128xf32, #tpu.memory_space<vmem>>, vector<1x128xf32>
    %65 = vector.shape_cast %64 : vector<1x128xf32> to vector<128xf32>
    %66 = vector.shape_cast %65 : vector<128xf32> to vector<1x128xf32>
    %67 = vector.broadcast %66 : vector<1x128xf32> to vector<8x128xf32>
    %68 = arith.addf %63, %67 : vector<8x128xf32>
    %cst_39 = arith.constant 0.000000e+00 : f32
    %69 = vector.broadcast %cst_39 : f32 to vector<8x128xf32>
    %70 = arith.maximumf %68, %69 : vector<8x128xf32>
    %c6 = arith.constant 6 : index
    %c0_40 = arith.constant 0 : index
    %c0_41 = arith.constant 0 : index
    %71 = vector.load %arg2[%c6, %c0_40, %c0_41] : memref<8x128x128xf32, #tpu.memory_space<vmem>>, vector<1x128x128xf32>
    %72 = vector.shape_cast %71 : vector<1x128x128xf32> to vector<128x128xf32>
    %cst_42 = arith.constant dense<0.000000e+00> : vector<8x128xf32>
    %73 = tpu.matmul %70, %72, %cst_42 {dimension_numbers = #tpu.dot_dimension_numbers<[1], [0], [0], [1], [0, 0, 1, 1], [], []>} : vector<8x128xf32>, vector<128x128xf32>, vector<8x128xf32> -> vector<8x128xf32>
    %c6_43 = arith.constant 6 : index
    %c0_44 = arith.constant 0 : index
    %74 = vector.load %arg3[%c6_43, %c0_44] : memref<8x128xf32, #tpu.memory_space<vmem>>, vector<1x128xf32>
    %75 = vector.shape_cast %74 : vector<1x128xf32> to vector<128xf32>
    %76 = vector.shape_cast %75 : vector<128xf32> to vector<1x128xf32>
    %77 = vector.broadcast %76 : vector<1x128xf32> to vector<8x128xf32>
    %78 = arith.addf %73, %77 : vector<8x128xf32>
    %cst_45 = arith.constant 0.000000e+00 : f32
    %79 = vector.broadcast %cst_45 : f32 to vector<8x128xf32>
    %80 = arith.maximumf %78, %79 : vector<8x128xf32>
    %c7 = arith.constant 7 : index
    %c0_46 = arith.constant 0 : index
    %c0_47 = arith.constant 0 : index
    %81 = vector.load %arg2[%c7, %c0_46, %c0_47] : memref<8x128x128xf32, #tpu.memory_space<vmem>>, vector<1x128x128xf32>
    %82 = vector.shape_cast %81 : vector<1x128x128xf32> to vector<128x128xf32>
    %cst_48 = arith.constant dense<0.000000e+00> : vector<8x128xf32>
    %83 = tpu.matmul %80, %82, %cst_48 {dimension_numbers = #tpu.dot_dimension_numbers<[1], [0], [0], [1], [0, 0, 1, 1], [], []>} : vector<8x128xf32>, vector<128x128xf32>, vector<8x128xf32> -> vector<8x128xf32>
    %c7_49 = arith.constant 7 : index
    %c0_50 = arith.constant 0 : index
    %84 = vector.load %arg3[%c7_49, %c0_50] : memref<8x128xf32, #tpu.memory_space<vmem>>, vector<1x128xf32>
    %85 = vector.shape_cast %84 : vector<1x128xf32> to vector<128xf32>
    %86 = vector.shape_cast %85 : vector<128xf32> to vector<1x128xf32>
    %87 = vector.broadcast %86 : vector<1x128xf32> to vector<8x128xf32>
    %88 = arith.addf %83, %87 : vector<8x128xf32>
    %c0_51 = arith.constant 0 : index
    %c0_52 = arith.constant 0 : index
    %89 = vector.load %arg4[%c0_51, %c0_52] : memref<8x128xf32, #tpu.memory_space<vmem>>, vector<8x128xf32>
    tpu.vector_store %arg4[%c0_51, %c0_52], %88 {strides = array<i32>} : memref<8x128xf32, #tpu.memory_space<vmem>>, vector<8x128xf32>,
    return
  }
  func.func @transform_0(%arg0: i32) -> (i32, i32) {
    %c0_i32 = arith.constant 0 : i32
    %c0_i32_0 = arith.constant 0 : i32
    return %arg0, %c0_i32 : i32, i32
  }
  func.func @transform_1(%arg0: i32) -> (i32, i32, i32) {
    %c0_i32 = arith.constant 0 : i32
    %c0_i32_0 = arith.constant 0 : i32
    %c0_i32_1 = arith.constant 0 : i32
    %c0_i32_2 = arith.constant 0 : i32
    return %c0_i32, %c0_i32_0, %c0_i32_1 : i32, i32, i32
  }
  func.func @transform_2(%arg0: i32) -> (i32, i32) {
    %c0_i32 = arith.constant 0 : i32
    %c0_i32_0 = arith.constant 0 : i32
    %c0_i32_1 = arith.constant 0 : i32
    return %c0_i32, %c0_i32_0 : i32, i32
  }
  func.func @transform_3(%arg0: i32) -> (i32, i32) {
    %c0_i32 = arith.constant 0 : i32
    %c0_i32_0 = arith.constant 0 : i32
    return %arg0, %c0_i32 : i32, i32
  }
}

</mosaic_0001>

<bundles_post_ra>
// kernel: tpu_custom_call.1
= control target key start
LH: loop header
LB: loop body
LE: loop exit
PB: predicated region body
PF: predicated region fallthrough
CT: control target
= control target key end

     0   :  { %8 = vsyncpa [#allocation3], 0  ;;  %s1703_s0 = inlined_call_operand.hbm [shape: f32[8,128], index: 0, kind: input, shape index: {}]   ;;  %s1704_s1 = inlined_call_operand.hbm [shape: f32[8,128,128], index: 1, kind: input, shape index: {}]   ;;  %s1705_s2 = inlined_call_operand.hbm [shape: f32[8,128], index: 2, kind: input, shape index: {}]   ;;  %s1706_s3 = inlined_call_operand.hbm [shape: f32[8,128], index: 3, kind: output, shape index: {}]  }
   0x1   :  { %9 = vsyncpa [#allocation6], 0 }
   0x2   :  { %10 = vsyncpa [#allocation4], 0  ;;  %s1541_s12 = smov [#allocation5]   ;;  %s1447_s16 = scalar_lea.hbm %s1704_s1, 16384 }
   0x3   :  { %s26_s13 = sshll.u32 %s1541_s12, 4  ;;  %p1448_p0 = scmp.ne.s32.totalorder %s1704_s1, %s1447_s16  ;;  %s27_s13 = int_to_ptr.vmem [resolvable:$true] %s26_s13 }
   0x4   :  { %p1451_p1 = scmp.lt.u32.totalorder %s1447_s16, %s1704_s1 }
   0x6   :  { %p1453_p2 = pnand %p1451_p1, %p1448_p0 }
   0x8   :  { %1456 = shalt.err (!%p1453_p2)
}
   0x9   :  { %s1457_s21 = scalar_lea.vmem %s27_s13, 16384  ;;  %p1462_p4 = scmp.lt.s32.totalorder %s27_s13, %s27_s13 }
   0xa   :  { %p1458_p3 = scmp.ne.s32.totalorder %s27_s13, %s1457_s21  ;;  %p1463_p5 = scmp.lt.s32.totalorder %s1457_s21, %s1457_s21 }
   0xc   :  { %p1464_p6 = por %p1463_p5, %p1462_p4 }
   0xe   :  { %p1465_p7 = pnand %p1464_p6, %p1458_p3 }
  0x10   :  { %1468 = shalt.err (!%p1465_p7)
}
  0x11   :  { %s1542_s22 = smov 128   ;;  %s1543_s23 = smov 8  }
  0x12   :  { %32 = dma.hbm_to_vmem [thread:$0]  %s1704_s1, 16384, %s27_s13, [#allocation6], %s1542_s22, %s1542_s22, %s1543_s23  }
  0x13   :  { %s1544_s26 = smov [#allocation2]   ;;  %s1545_s28 = smov [#allocation7]  }
  0x14   :  { %s17_s27 = sshll.u32 %s1544_s26, 4  ;;  %s39_s29 = sshll.u32 %s1545_s28, 4  ;;  %s18_s27 = int_to_ptr.vmem [resolvable:$true] %s17_s27  ;;  %s40_s29 = int_to_ptr.vmem [resolvable:$true] %s39_s29 }
  0x15   :  { %s1469_s5 = scalar_lea.hbm %s1703_s0, 128 }
  0x16   :  { %p1470_p8 = scmp.ne.s32.totalorder %s1703_s0, %s1469_s5  ;;  %p1473_p9 = scmp.lt.u32.totalorder %s1469_s5, %s1703_s0 }
  0x18   :  { %p1475_p10 = pnand %p1473_p9, %p1470_p8 }
  0x1a   :  { %1478 = shalt.err (!%p1475_p10)
}
  0x1b   :  { %s1479_s1 = scalar_lea.vmem %s18_s27, 128  ;;  %p1484_p12 = scmp.lt.s32.totalorder %s18_s27, %s18_s27 }
  0x1c   :  { %p1480_p11 = scmp.ne.s32.totalorder %s18_s27, %s1479_s1  ;;  %p1485_p13 = scmp.lt.s32.totalorder %s1479_s1, %s1479_s1 }
  0x1e   :  { %p1486_p0 = por %p1485_p13, %p1484_p12 }
  0x20   :  { %p1487_p1 = pnand %p1486_p0, %p1480_p11 }
  0x22   :  { %1490 = shalt.err (!%p1487_p1)
}
  0x23   :  { %20 = dma.hbm_to_vmem [thread:$0]  %s1703_s0, 128, %s18_s27, [#allocation3]  }
  0x24   :  { %s1491_s14 = scalar_lea.hbm %s1705_s2, 128 }
  0x25   :  { %p1492_p2 = scmp.ne.s32.totalorder %s1705_s2, %s1491_s14  ;;  %p1495_p3 = scmp.lt.u32.totalorder %s1491_s14, %s1705_s2 }
  0x27   :  { %p1497_p4 = pnand %p1495_p3, %p1492_p2 }
  0x29   :  { %1500 = shalt.err (!%p1497_p4)
}
  0x2a   :  { %s1501_s19 = scalar_lea.vmem %s40_s29, 128  ;;  %p1506_p6 = scmp.lt.s32.totalorder %s40_s29, %s40_s29 }
  0x2b   :  { %p1502_p5 = scmp.ne.s32.totalorder %s40_s29, %s1501_s19  ;;  %p1507_p7 = scmp.lt.s32.totalorder %s1501_s19, %s1501_s19 }
  0x2d   :  { %p1508_p8 = por %p1507_p7, %p1506_p6 }
  0x2f   :  { %p1509_p9 = pnand %p1508_p8, %p1502_p5 }
  0x31   :  { %1512 = shalt.err (!%p1509_p9)
}
  0x32   :  { %42 = dma.hbm_to_vmem [thread:$0]  %s1705_s2, 128, %s40_s29, [#allocation6]  }
  0x33   :  { %1535 = dma.done.wait [#allocation3], 128  }
  0x34   :  { %1536 = vsyncadd [#allocation3], 4294967168 }
  0x35   :  { %1537 = dma.done.wait [#allocation6], 16512  }
  0x36   :  { %1538 = vsyncadd [#allocation6], 4294950784  ;;  %v1546_v0 = vmov 0.0|0.0   ;;  %v1608_v1 = vld [vmem:[#allocation2] sm:$0xff]  ;;  %v61_v2 = vld [vmem:[#allocation5] sm:$0xff]  ;;  %vm1547_vm0 = vmmov 0  }
  0x37   :  { %1244 = vmatprep.subr.bf16.mxu0 %v1546_v0  ;;  %1268 = vmatprep.subr.bf16.mxu1 %v1546_v0  ;;  %v62_v3 = vld [vmem:[#allocation5 + $0x8] sm:$0xff]  ;;  %v53_v4 = vmul.f32 %v1608_v1, %v1608_v1  ;;  %v63_v6 = vld [vmem:[#allocation5 + $0x10] sm:$0xff]  ;;  %v64_v7 = vld [vmem:[#allocation5 + $0x18] sm:$0xff]  ;;  %v1548_v23 = vmov 0.0   ;;  %s1549_s2 = smov [#allocation8]  }
  0x38   :  { %v1245_v5 = vpack.c.bf16 %v62_v3, %v61_v2  ;;  %v1248_v8 = vpack.c.bf16 %v64_v7, %v63_v6  ;;  %v65_v9 = vld [vmem:[#allocation5 + $0x20] sm:$0xff]  ;;  %v66_v10 = vld [vmem:[#allocation5 + $0x28] sm:$0xff]  ;;  %v67_v12 = vld [vmem:[#allocation5 + $0x30] sm:$0xff]  ;;  %996 = vmatprep.mubr.msk.f32.mxu0 %vm1547_vm0, %v1548_v23  ;;  %1031 = vmatprep.mubr.msk.f32.mxu1 %vm1547_vm0, %v1548_v23  ;;  %s810_s21 = sshll.u32 %s1549_s2, 4  ;;  %s811_s21 = int_to_ptr.vmem [resolvable:$true] %s810_s21 }
  0x39   :  { %54 = vadd.xlane.f32.xlu0 %v53_v4  ;;  %v1251_v11 = vpack.c.bf16 %v66_v10, %v65_v9  ;;  %v68_v13 = vld [vmem:[#allocation5 + $0x38] sm:$0xff]  ;;  %v69_v15 = vld [vmem:[#allocation5 + $0x40] sm:$0xff]  ;;  %v70_v16 = vld [vmem:[#allocation5 + $0x48] sm:$0xff]  ;;  %s1513_s22 = scalar_lea.vmem %s811_s21, 128  ;;  %p1518_p11 = scmp.lt.s32.totalorder %s811_s21, %s811_s21 }
  0x3a   :  { %1246 = vmatpush3.bf16.msra.mxu0 %v1245_v5  ;;  %v1254_v14 = vpack.c.bf16 %v68_v13, %v67_v12  ;;  %v1257_v17 = vpack.c.bf16 %v70_v16, %v69_v15  ;;  %v71_v18 = vld [vmem:[#allocation5 + $0x50] sm:$0xff]  ;;  %v72_v19 = vld [vmem:[#allocation5 + $0x58] sm:$0xff]  ;;  %v73_v21 = vld [vmem:[#allocation5 + $0x60] sm:$0xff]  ;;  %p1514_p10 = scmp.ne.s32.totalorder %s811_s21, %s1513_s22  ;;  %p1519_p12 = scmp.lt.s32.totalorder %s1513_s22, %s1513_s22 }
  0x3b   :  { %1247 = vmatprep.subr.bf16.mxu0 %v1546_v0  ;;  %v1260_v20 = vpack.c.bf16 %v72_v19, %v71_v18  ;;  %v74_v22 = vld [vmem:[#allocation5 + $0x68] sm:$0xff]  ;;  %v75_v25 = vld [vmem:[#allocation5 + $0x70] sm:$0xff]  ;;  %v76_v26 = vld [vmem:[#allocation5 + $0x78] sm:$0xff] }
  0x3c   :  { %v1263_v24 = vpack.c.bf16 %v74_v22, %v73_v21  ;;  %v1266_v27 = vpack.c.bf16 %v76_v26, %v75_v25  ;;  %v154_v28 = vld [vmem:[#allocation5 + $0x80] sm:$0xff]  ;;  %v155_v29 = vld [vmem:[#allocation5 + $0x88] sm:$0xff]  ;;  %v156_v30 = vld [vmem:[#allocation5 + $0x90] sm:$0xff]  ;;  %p1520_p13 = por %p1519_p12, %p1518_p11 }
  0x3d   :  { %v1269_v31 = vpack.c.bf16 %v155_v29, %v154_v28  ;;  %v157_v32 = vld [vmem:[#allocation5 + $0x98] sm:$0xff]  ;;  %v158_v34 = vld [vmem:[#allocation5 + $0xa0] sm:$0xff]  ;;  %v159_v35 = vld [vmem:[#allocation5 + $0xa8] sm:$0xff] }
  0x3e   :  { %1249 = vmatpush3.bf16.msra.mxu0 %v1248_v8  ;;  %v1272_v33 = vpack.c.bf16 %v157_v32, %v156_v30  ;;  %v1275_v36 = vpack.c.bf16 %v159_v35, %v158_v34  ;;  %v160_v37 = vld [vmem:[#allocation5 + $0xb0] sm:$0xff]  ;;  %v161_v38 = vld [vmem:[#allocation5 + $0xb8] sm:$0xff]  ;;  %v162_v40 = vld [vmem:[#allocation5 + $0xc0] sm:$0xff]  ;;  %p1521_p0 = pnand %p1520_p13, %p1514_p10 }
  0x3f   :  { %1250 = vmatprep.subr.bf16.mxu0 %v1546_v0  ;;  %1270 = vmatpush3.bf16.msra.mxu1 %v1269_v31  ;;  %v1278_v39 = vpack.c.bf16 %v161_v38, %v160_v37  ;;  %v163_v41 = vld [vmem:[#allocation5 + $0xc8] sm:$0xff]  ;;  %v164_v43 = vld [vmem:[#allocation5 + $0xd0] sm:$0xff]  ;;  %v165_v44 = vld [vmem:[#allocation5 + $0xd8] sm:$0xff] }
  0x40   :  { %1271 = vmatprep.subr.bf16.mxu1 %v1546_v0  ;;  %v1281_v42 = vpack.c.bf16 %v163_v41, %v162_v40  ;;  %v1284_v45 = vpack.c.bf16 %v165_v44, %v164_v43  ;;  %v166_v46 = vld [vmem:[#allocation5 + $0xe0] sm:$0xff]  ;;  %v167_v47 = vld [vmem:[#allocation5 + $0xe8] sm:$0xff]  ;;  %v168_v54 = vld [vmem:[#allocation5 + $0xf0] sm:$0xff] }
  0x41   :  { %v1287_v48 = vpack.c.bf16 %v167_v47, %v166_v46  ;;  %v169_v55 = vld [vmem:[#allocation5 + $0xf8] sm:$0xff]  ;;  %v247_v57 = vld [vmem:[#allocation5 + $0x100] sm:$0xff]  ;;  %v248_v58 = vld [vmem:[#allocation5 + $0x108] sm:$0xff] }
  0x42   :  { %1252 = vmatpush3.bf16.msra.mxu0 %v1251_v11  ;;  %v1290_v56 = vpack.c.bf16 %v169_v55, %v168_v54  ;;  %v249_v59 = vld [vmem:[#allocation5 + $0x110] sm:$0xff]  ;;  %v1293_v60 = vpack.c.bf16 %v248_v58, %v247_v57  ;;  %v250_v61 = vld [vmem:[#allocation5 + $0x118] sm:$0xff]  ;;  %v251_v63 = vld [vmem:[#allocation5 + $0x120] sm:$0xff] }
  0x43   :  { %1253 = vmatprep.subr.bf16.mxu0 %v1546_v0  ;;  %1273 = vmatpush3.bf16.msra.mxu1 %v1272_v33  ;;  %v1296_v62 = vpack.c.bf16 %v250_v61, %v249_v59  ;;  %v253_v3 = vld [vmem:[#allocation5 + $0x130] sm:$0xff]  ;;  %v254_v4 = vld [vmem:[#allocation5 + $0x138] sm:$0xff]  ;;  %v255_v6 = vld [vmem:[#allocation5 + $0x140] sm:$0xff] }
  0x44   :  { %1274 = vmatprep.subr.bf16.mxu1 %v1546_v0  ;;  %v1302_v5 = vpack.c.bf16 %v254_v4, %v253_v3  ;;  %v256_v7 = vld [vmem:[#allocation5 + $0x148] sm:$0xff]  ;;  %v257_v9 = vld [vmem:[#allocation5 + $0x150] sm:$0xff]  ;;  %v258_v10 = vld [vmem:[#allocation5 + $0x158] sm:$0xff] }
  0x45   :  { %v1305_v8 = vpack.c.bf16 %v256_v7, %v255_v6  ;;  %v1308_v11 = vpack.c.bf16 %v258_v10, %v257_v9  ;;  %v259_v12 = vld [vmem:[#allocation5 + $0x160] sm:$0xff]  ;;  %v260_v13 = vld [vmem:[#allocation5 + $0x168] sm:$0xff]  ;;  %v262_v21 = vld [vmem:[#allocation5 + $0x178] sm:$0xff] }
  0x46   :  { %1255 = vmatpush3.bf16.msra.mxu0 %v1254_v14  ;;  %v1311_v14 = vpack.c.bf16 %v260_v13, %v259_v12  ;;  %v820_v15 = vld [vmem:[#allocation7] ss:$0 sm:$0xff]  ;;  %v341_v25 = vld [vmem:[#allocation5 + $0x188] sm:$0xff]  ;;  %v342_v26 = vld [vmem:[#allocation5 + $0x190] sm:$0xff] }
  0x47   :  { %1256 = vmatprep.subr.bf16.mxu0 %v1546_v0  ;;  %1276 = vmatpush3.bf16.msra.mxu1 %v1275_v36  ;;  %v343_v28 = vld [vmem:[#allocation5 + $0x198] sm:$0xff]  ;;  %v344_v30 = vld [vmem:[#allocation5 + $0x1a0] sm:$0xff]  ;;  %v345_v31 = vld [vmem:[#allocation5 + $0x1a8] sm:$0xff] }
  0x48   :  { %1277 = vmatprep.subr.bf16.mxu1 %v1546_v0  ;;  %v1320_v29 = vpack.c.bf16 %v343_v28, %v342_v26  ;;  %v1323_v32 = vpack.c.bf16 %v345_v31, %v344_v30  ;;  %v346_v33 = vld [vmem:[#allocation5 + $0x1b0] sm:$0xff]  ;;  %v347_v34 = vld [vmem:[#allocation5 + $0x1b8] sm:$0xff]  ;;  %v348_v36 = vld [vmem:[#allocation5 + $0x1c0] sm:$0xff] }
  0x49   :  { %v1326_v35 = vpack.c.bf16 %v347_v34, %v346_v33  ;;  %v349_v37 = vld [vmem:[#allocation5 + $0x1c8] sm:$0xff]  ;;  %v351_v40 = vld [vmem:[#allocation5 + $0x1d8] sm:$0xff]  ;;  %v435_v55 = vld [vmem:[#allocation5 + $0x210] sm:$0xff] }
  0x4a   :  { %1258 = vmatpush3.bf16.msra.mxu0 %v1257_v17  ;;  %v1329_v38 = vpack.c.bf16 %v349_v37, %v348_v36  ;;  %v353_v43 = vld [vmem:[#allocation5 + $0x1e8] sm:$0xff]  ;;  %v436_v57 = vld [vmem:[#allocation5 + $0x218] sm:$0xff]  ;;  %v437_v59 = vld [vmem:[#allocation5 + $0x220] sm:$0xff] }
  0x4b   :  { %1259 = vmatprep.subr.bf16.mxu0 %v1546_v0  ;;  %1279 = vmatpush3.bf16.msra.mxu1 %v1278_v39  ;;  %v350_v39 = vld [vmem:[#allocation5 + $0x1d0] sm:$0xff]  ;;  %v434_v54 = vld [vmem:[#allocation5 + $0x208] sm:$0xff]  ;;  %v1344_v58 = vpack.c.bf16 %v436_v57, %v435_v55  ;;  %v444_v6 = vld [vmem:[#allocation5 + $0x258] sm:$0xff] }
  0x4c   :  { %1280 = vmatprep.subr.bf16.mxu1 %v1546_v0  ;;  %v1332_v41 = vpack.c.bf16 %v351_v40, %v350_v39  ;;  %v442_v3 = vld [vmem:[#allocation5 + $0x248] sm:$0xff]  ;;  %v530_v26 = vld [vmem:[#allocation5 + $0x2a0] sm:$0xff]  ;;  %v533_v30 = vld [vmem:[#allocation5 + $0x2b8] sm:$0xff] }
  0x4d   :  { %v446_v9 = vld [vmem:[#allocation5 + $0x268] sm:$0xff]  ;;  %v537_v36 = vld [vmem:[#allocation5 + $0x2d8] sm:$0xff]  ;;  %v623_v55 = vld [vmem:[#allocation5 + $0x320] sm:$0xff] }
  0x4e   :  { %1261 = vmatpush3.bf16.msra.mxu0 %v1260_v20  ;;  %v261_v20 = vld [vmem:[#allocation5 + $0x170] sm:$0xff]  ;;  %v535_v33 = vld [vmem:[#allocation5 + $0x2c8] sm:$0xff] }
  0x4f   :  { %1262 = vmatprep.subr.bf16.mxu0 %v1546_v0  ;;  %1282 = vmatpush3.bf16.msra.mxu1 %v1281_v42  ;;  %v1314_v22 = vpack.c.bf16 %v262_v21, %v261_v20  ;;  %v352_v42 = vld [vmem:[#allocation5 + $0x1e0] sm:$0xff]  ;;  %v527_v20 = vld [vmem:[#allocation5 + $0x288] sm:$0xff]  ;;  %v528_v21 = vld [vmem:[#allocation5 + $0x290] sm:$0xff] }
  0x50   :  { %1283 = vmatprep.subr.bf16.mxu1 %v1546_v0  ;;  %v1335_v44 = vpack.c.bf16 %v353_v43, %v352_v42  ;;  %v539_v39 = vld [vmem:[#allocation5 + $0x2e8] sm:$0xff] }
  0x52   :  { %1264 = vmatpush3.bf16.msra.mxu0 %v1263_v24  ;;  %v340_v24 = vld [vmem:[#allocation5 + $0x180] sm:$0xff] }
  0x53   :  { %1265 = vmatprep.subr.bf16.mxu0 %v1546_v0  ;;  %1285 = vmatpush3.bf16.msra.mxu1 %v1284_v45  ;;  %v821_v45 = vld [vmem:[#allocation7 + $0x1] ss:$0 sm:$0xff] }
  0x54   :  { %1286 = vmatprep.subr.bf16.mxu1 %v1546_v0 }
  0x56   :  { %1267 = vmatpush3.bf16.msra.mxu0 %v1266_v27  ;;  %v1317_v27 = vpack.c.bf16 %v341_v25, %v340_v24  ;;  %v529_v24 = vld [vmem:[#allocation5 + $0x298] sm:$0xff] }
  0x57   :  { %1292 = vmatprep.subr.bf16.mxu0 %v1546_v0  ;;  %1288 = vmatpush3.bf16.msra.mxu1 %v1287_v48  ;;  %v1368_v25 = vpack.c.bf16 %v529_v24, %v528_v21  ;;  %v716_v21 = vld [vmem:[#allocation5 + $0x3a0] sm:$0xff] }
  0x58   :  { %1289 = vmatprep.subr.bf16.mxu1 %v1546_v0 }
  0x5b   :  { %1291 = vmatpush3.bf16.msra.mxu1 %v1290_v56 }
  0x5c   :  { %1316 = vmatprep.subr.bf16.mxu1 %v1546_v0 }
  0xc6   :  { %v55_v49 = vpop.xlane.xlu0 %54 }
  0xc7   :  { %v57_v50 = vmul.f32 0.0078125, %v55_v49 }
  0xc9   :  { %v58_v51 = vadd.f32 1e-08, %v57_v50  ;;  %v354_v50 = vld [vmem:[#allocation5 + $0x1f0] sm:$0xff] }
  0xcb   :  { %1445 = vrsqrt.f32 %v58_v51  ;;  %v355_v51 = vld [vmem:[#allocation5 + $0x1f8] sm:$0xff] }
  0xd5   :  { %v1446_v52 = vpop.eup %1445 }
  0xd6   :  { %v60_v53 = vmul.f32 %v1446_v52, %v1608_v1  ;;  %v252_v1 = vld [vmem:[#allocation5 + $0x128] sm:$0xff]  ;;  %v1338_v52 = vpack.c.bf16 %v355_v51, %v354_v50  ;;  %v621_v51 = vld [vmem:[#allocation5 + $0x310] sm:$0xff] }
  0xd7   :  { %v1299_v2 = vpack.c.bf16 %v252_v1, %v251_v63  ;;  %v440_v63 = vld [vmem:[#allocation5 + $0x238] sm:$0xff]  ;;  %v620_v50 = vld [vmem:[#allocation5 + $0x308] sm:$0xff] }
  0xd8   :  { %997 = vmatmul.mubr.f32.vlgmr.msra.gmra.mrb[0].mxu0 %v60_v53  ;;  %v433_v53 = vld [vmem:[#allocation5 + $0x200] sm:$0xff] }
  0xd9   :  { %1066 = vmatprep.mubr.msk.f32.mxu0 %vm1547_vm0, %v1548_v23  ;;  %1294 = vmatpush3.bf16.msra.mxu0 %v1293_v60  ;;  %v1341_v56 = vpack.c.bf16 %v434_v54, %v433_v53  ;;  %v438_v60 = vld [vmem:[#allocation5 + $0x228] sm:$0xff]  ;;  %v622_v53 = vld [vmem:[#allocation5 + $0x318] sm:$0xff] }
  0xda   :  { %1295 = vmatprep.subr.bf16.mxu0 %v1546_v0  ;;  %v1347_v61 = vpack.c.bf16 %v438_v60, %v437_v59  ;;  %v1392_v54 = vpack.c.bf16 %v622_v53, %v621_v51  ;;  %v626_v59 = vld [vmem:[#allocation5 + $0x338] sm:$0xff] }
  0xdd   :  { %1297 = vmatpush3.bf16.msra.mxu0 %v1296_v62  ;;  %v439_v62 = vld [vmem:[#allocation5 + $0x230] sm:$0xff] }
  0xde   :  { %1298 = vmatprep.subr.bf16.mxu0 %v1546_v0  ;;  %v1350_v1 = vpack.c.bf16 %v440_v63, %v439_v62  ;;  %v628_v62 = vld [vmem:[#allocation5 + $0x348] sm:$0xff] }
  0xe1   :  { %1300 = vmatpush3.bf16.msra.mxu0 %v1299_v2  ;;  %v441_v2 = vld [vmem:[#allocation5 + $0x240] sm:$0xff] }
  0xe2   :  { %1301 = vmatprep.subr.bf16.mxu0 %v1546_v0  ;;  %v1353_v4 = vpack.c.bf16 %v442_v3, %v441_v2  ;;  %v630_v2 = vld [vmem:[#allocation5 + $0x358] sm:$0xff] }
  0xe5   :  { %1303 = vmatpush3.bf16.msra.mxu0 %v1302_v5  ;;  %v443_v5 = vld [vmem:[#allocation5 + $0x250] sm:$0xff] }
  0xe6   :  { %1304 = vmatprep.subr.bf16.mxu0 %v1546_v0  ;;  %v1356_v7 = vpack.c.bf16 %v444_v6, %v443_v5  ;;  %v632_v5 = vld [vmem:[#allocation5 + $0x368] sm:$0xff] }
  0xe9   :  { %1306 = vmatpush3.bf16.msra.mxu0 %v1305_v8  ;;  %v445_v8 = vld [vmem:[#allocation5 + $0x260] sm:$0xff] }
  0xea   :  { %1307 = vmatprep.subr.bf16.mxu0 %v1546_v0  ;;  %v1359_v10 = vpack.c.bf16 %v446_v9, %v445_v8 }
  0xed   :  { %1309 = vmatpush3.bf16.msra.mxu0 %v1308_v11  ;;  %v822_v11 = vld [vmem:[#allocation7 + $0x2] ss:$0 sm:$0xff] }
  0xee   :  { %1310 = vmatprep.subr.bf16.mxu0 %v1546_v0 }
  0xf1   :  { %1312 = vmatpush3.bf16.msra.mxu0 %v1311_v14 }
  0xf2   :  { %1313 = vmatprep.subr.bf16.mxu0 %v1546_v0 }
  0xf5   :  { %1315 = vmatpush3.bf16.msra.mxu0 %v1314_v22 }
  0xf6   :  { %1340 = vmatprep.subr.bf16.mxu0 %v1546_v0 }
 0x1ab   :  { %v148_v16 = vpop.f32.mrb[0].mxu0 }
 0x1ac   :  { %v149_v17 = vadd.f32 %v820_v15, %v148_v16  ;;  %v998_v18 = vpop.f32.mrb[1].mxu0  ;;  %v447_v16 = vld [vmem:[#allocation5 + $0x270] sm:$0xff] }
 0x1ae   :  { %v152_v19 = vmax.f32 %v149_v17, 0.0  ;;  %v448_v17 = vld [vmem:[#allocation5 + $0x278] sm:$0xff] }
 0x1af   :  { %v1362_v18 = vpack.c.bf16 %v448_v17, %v447_v16  ;;  %v713_v16 = vld [vmem:[#allocation5 + $0x388] sm:$0xff]  ;;  %v714_v17 = vld [vmem:[#allocation5 + $0x390] sm:$0xff] }
 0x1b0   :  { %1032 = vmatmul.mubr.f32.vlgmr.msra.gmra.mrb[0].mxu1 %v152_v19  ;;  %v526_v19 = vld [vmem:[#allocation5 + $0x280] sm:$0xff] }
 0x1b1   :  { %1101 = vmatprep.mubr.msk.f32.mxu1 %vm1547_vm0, %v1548_v23  ;;  %1318 = vmatpush3.bf16.msra.mxu1 %v1317_v27  ;;  %v1365_v22 = vpack.c.bf16 %v527_v20, %v526_v19  ;;  %v531_v27 = vld [vmem:[#allocation5 + $0x2a8] sm:$0xff]  ;;  %v715_v19 = vld [vmem:[#allocation5 + $0x398] sm:$0xff] }
 0x1b2   :  { %1319 = vmatprep.subr.bf16.mxu1 %v1546_v0  ;;  %v1371_v28 = vpack.c.bf16 %v531_v27, %v530_v26  ;;  %v1416_v20 = vpack.c.bf16 %v715_v19, %v714_v17  ;;  %v720_v27 = vld [vmem:[#allocation5 + $0x3c0] sm:$0xff] }
 0x1b5   :  { %1321 = vmatpush3.bf16.msra.mxu1 %v1320_v29  ;;  %v532_v29 = vld [vmem:[#allocation5 + $0x2b0] sm:$0xff] }
 0x1b6   :  { %1322 = vmatprep.subr.bf16.mxu1 %v1546_v0  ;;  %v1374_v31 = vpack.c.bf16 %v533_v30, %v532_v29  ;;  %v722_v30 = vld [vmem:[#allocation5 + $0x3d0] sm:$0xff] }
 0x1b9   :  { %1324 = vmatpush3.bf16.msra.mxu1 %v1323_v32  ;;  %v534_v32 = vld [vmem:[#allocation5 + $0x2c0] sm:$0xff] }
 0x1ba   :  { %1325 = vmatprep.subr.bf16.mxu1 %v1546_v0  ;;  %v1377_v34 = vpack.c.bf16 %v535_v33, %v534_v32  ;;  %v724_v33 = vld [vmem:[#allocation5 + $0x3e0] sm:$0xff] }
 0x1bd   :  { %1327 = vmatpush3.bf16.msra.mxu1 %v1326_v35  ;;  %v536_v35 = vld [vmem:[#allocation5 + $0x2d0] sm:$0xff] }
 0x1be   :  { %1328 = vmatprep.subr.bf16.mxu1 %v1546_v0  ;;  %v1380_v37 = vpack.c.bf16 %v537_v36, %v536_v35  ;;  %v825_v36 = vld [vmem:[#allocation7 + $0x5] ss:$0 sm:$0xff] }
 0x1c1   :  { %1330 = vmatpush3.bf16.msra.mxu1 %v1329_v38  ;;  %v538_v38 = vld [vmem:[#allocation5 + $0x2e0] sm:$0xff] }
 0x1c2   :  { %1331 = vmatprep.subr.bf16.mxu1 %v1546_v0  ;;  %v1383_v40 = vpack.c.bf16 %v539_v39, %v538_v38 }
 0x1c5   :  { %1333 = vmatpush3.bf16.msra.mxu1 %v1332_v41  ;;  %v823_v41 = vld [vmem:[#allocation7 + $0x3] ss:$0 sm:$0xff] }
 0x1c6   :  { %1334 = vmatprep.subr.bf16.mxu1 %v1546_v0 }
 0x1c9   :  { %1336 = vmatpush3.bf16.msra.mxu1 %v1335_v44 }
 0x1ca   :  { %1337 = vmatprep.subr.bf16.mxu1 %v1546_v0 }
 0x1cd   :  { %1339 = vmatpush3.bf16.msra.mxu1 %v1338_v52 }
 0x1ce   :  { %1364 = vmatprep.subr.bf16.mxu1 %v1546_v0 }
 0x283   :  { %v241_v46 = vpop.f32.mrb[0].mxu1 }
 0x284   :  { %v242_v47 = vadd.f32 %v821_v45, %v241_v46  ;;  %v1033_v48 = vpop.f32.mrb[1].mxu1  ;;  %v540_v46 = vld [vmem:[#allocation5 + $0x2f0] sm:$0xff] }
 0x286   :  { %v245_v49 = vmax.f32 %v242_v47, 0.0  ;;  %v541_v47 = vld [vmem:[#allocation5 + $0x2f8] sm:$0xff] }
 0x287   :  { %v1386_v48 = vpack.c.bf16 %v541_v47, %v540_v46 }
 0x288   :  { %1067 = vmatmul.mubr.f32.vlgmr.msra.gmra.mrb[2].mxu0 %v245_v49  ;;  %v619_v49 = vld [vmem:[#allocation5 + $0x300] sm:$0xff] }
 0x289   :  { %1136 = vmatprep.mubr.msk.f32.mxu0 %vm1547_vm0, %v1548_v23  ;;  %1342 = vmatpush3.bf16.msra.mxu0 %v1341_v56  ;;  %v1389_v52 = vpack.c.bf16 %v620_v50, %v619_v49  ;;  %v624_v56 = vld [vmem:[#allocation5 + $0x328] sm:$0xff]  ;;  %v827_v49 = vld [vmem:[#allocation7 + $0x7] ss:$0 sm:$0xff] }
 0x28a   :  { %1343 = vmatprep.subr.bf16.mxu0 %v1546_v0  ;;  %v1395_v57 = vpack.c.bf16 %v624_v56, %v623_v55 }
 0x28d   :  { %1345 = vmatpush3.bf16.msra.mxu0 %v1344_v58  ;;  %v625_v58 = vld [vmem:[#allocation5 + $0x330] sm:$0xff] }
 0x28e   :  { %1346 = vmatprep.subr.bf16.mxu0 %v1546_v0  ;;  %v1398_v60 = vpack.c.bf16 %v626_v59, %v625_v58 }
 0x291   :  { %1348 = vmatpush3.bf16.msra.mxu0 %v1347_v61  ;;  %v627_v61 = vld [vmem:[#allocation5 + $0x340] sm:$0xff] }
 0x292   :  { %1349 = vmatprep.subr.bf16.mxu0 %v1546_v0  ;;  %v1401_v63 = vpack.c.bf16 %v628_v62, %v627_v61 }
 0x295   :  { %1351 = vmatpush3.bf16.msra.mxu0 %v1350_v1  ;;  %v629_v1 = vld [vmem:[#allocation5 + $0x350] sm:$0xff] }
 0x296   :  { %1352 = vmatprep.subr.bf16.mxu0 %v1546_v0  ;;  %v1404_v3 = vpack.c.bf16 %v630_v2, %v629_v1 }
 0x299   :  { %1354 = vmatpush3.bf16.msra.mxu0 %v1353_v4  ;;  %v631_v4 = vld [vmem:[#allocation5 + $0x360] sm:$0xff] }
 0x29a   :  { %1355 = vmatprep.subr.bf16.mxu0 %v1546_v0  ;;  %v1407_v6 = vpack.c.bf16 %v632_v5, %v631_v4 }
 0x29d   :  { %1357 = vmatpush3.bf16.msra.mxu0 %v1356_v7  ;;  %v824_v7 = vld [vmem:[#allocation7 + $0x4] ss:$0 sm:$0xff] }
 0x29e   :  { %1358 = vmatprep.subr.bf16.mxu0 %v1546_v0 }
 0x2a1   :  { %1360 = vmatpush3.bf16.msra.mxu0 %v1359_v10 }
 0x2a2   :  { %1361 = vmatprep.subr.bf16.mxu0 %v1546_v0 }
 0x2a5   :  { %1363 = vmatpush3.bf16.msra.mxu0 %v1362_v18 }
 0x2a6   :  { %1388 = vmatprep.subr.bf16.mxu0 %v1546_v0 }
 0x35b   :  { %v334_v12 = vpop.f32.mrb[2].mxu0 }
 0x35c   :  { %v335_v13 = vadd.f32 %v822_v11, %v334_v12  ;;  %v1068_v14 = vpop.f32.mrb[3].mxu0  ;;  %v633_v12 = vld [vmem:[#allocation5 + $0x370] sm:$0xff] }
 0x35e   :  { %v338_v15 = vmax.f32 %v335_v13, 0.0  ;;  %v634_v13 = vld [vmem:[#allocation5 + $0x378] sm:$0xff] }
 0x35f   :  { %v1410_v14 = vpack.c.bf16 %v634_v13, %v633_v12 }
 0x360   :  { %1102 = vmatmul.mubr.f32.vlgmr.msra.gmra.mrb[2].mxu1 %v338_v15  ;;  %v712_v15 = vld [vmem:[#allocation5 + $0x380] sm:$0xff] }
 0x361   :  { %1171 = vmatprep.mubr.msk.f32.mxu1 %vm1547_vm0, %v1548_v23  ;;  %1366 = vmatpush3.bf16.msra.mxu1 %v1365_v22  ;;  %v1413_v18 = vpack.c.bf16 %v713_v16, %v712_v15  ;;  %v717_v22 = vld [vmem:[#allocation5 + $0x3a8] sm:$0xff] }
 0x362   :  { %1367 = vmatprep.subr.bf16.mxu1 %v1546_v0  ;;  %v1419_v24 = vpack.c.bf16 %v717_v22, %v716_v21 }
 0x365   :  { %1369 = vmatpush3.bf16.msra.mxu1 %v1368_v25  ;;  %v719_v25 = vld [vmem:[#allocation5 + $0x3b8] sm:$0xff] }
 0x366   :  { %1370 = vmatprep.subr.bf16.mxu1 %v1546_v0 }
 0x369   :  { %1372 = vmatpush3.bf16.msra.mxu1 %v1371_v28  ;;  %v721_v28 = vld [vmem:[#allocation5 + $0x3c8] sm:$0xff] }
 0x36a   :  { %1373 = vmatprep.subr.bf16.mxu1 %v1546_v0  ;;  %v1425_v29 = vpack.c.bf16 %v721_v28, %v720_v27 }
 0x36d   :  { %1375 = vmatpush3.bf16.msra.mxu1 %v1374_v31  ;;  %v723_v31 = vld [vmem:[#allocation5 + $0x3d8] sm:$0xff] }
 0x36e   :  { %1376 = vmatprep.subr.bf16.mxu1 %v1546_v0  ;;  %v1428_v32 = vpack.c.bf16 %v723_v31, %v722_v30 }
 0x371   :  { %1378 = vmatpush3.bf16.msra.mxu1 %v1377_v34  ;;  %v725_v34 = vld [vmem:[#allocation5 + $0x3e8] sm:$0xff] }
 0x372   :  { %1379 = vmatprep.subr.bf16.mxu1 %v1546_v0  ;;  %v1431_v35 = vpack.c.bf16 %v725_v34, %v724_v33 }
 0x375   :  { %1381 = vmatpush3.bf16.msra.mxu1 %v1380_v37 }
 0x376   :  { %1382 = vmatprep.subr.bf16.mxu1 %v1546_v0 }
 0x379   :  { %1384 = vmatpush3.bf16.msra.mxu1 %v1383_v40 }
 0x37a   :  { %1385 = vmatprep.subr.bf16.mxu1 %v1546_v0 }
 0x37d   :  { %1387 = vmatpush3.bf16.msra.mxu1 %v1386_v48 }
 0x37e   :  { %1412 = vmatprep.subr.bf16.mxu1 %v1546_v0 }
 0x433   :  { %v427_v42 = vpop.f32.mrb[2].mxu1 }
 0x434   :  { %v428_v43 = vadd.f32 %v823_v41, %v427_v42  ;;  %v1103_v44 = vpop.f32.mrb[3].mxu1  ;;  %v726_v41 = vld [vmem:[#allocation5 + $0x3f0] sm:$0xff]  ;;  %v727_v42 = vld [vmem:[#allocation5 + $0x3f8] sm:$0xff] }
 0x435   :  { %v826_v44 = vld [vmem:[#allocation7 + $0x6] ss:$0 sm:$0xff] }
 0x436   :  { %v431_v45 = vmax.f32 %v428_v43, 0.0  ;;  %v1434_v43 = vpack.c.bf16 %v727_v42, %v726_v41 }
 0x438   :  { %1137 = vmatmul.mubr.f32.vlgmr.msra.gmra.mrb[4].mxu0 %v431_v45 }
 0x439   :  { %1206 = vmatprep.mubr.msk.f32.mxu0 %vm1547_vm0, %v1548_v23  ;;  %1390 = vmatpush3.bf16.msra.mxu0 %v1389_v52 }
 0x43a   :  { %1391 = vmatprep.subr.bf16.mxu0 %v1546_v0 }
 0x43d   :  { %1393 = vmatpush3.bf16.msra.mxu0 %v1392_v54 }
 0x43e   :  { %1394 = vmatprep.subr.bf16.mxu0 %v1546_v0 }
 0x441   :  { %1396 = vmatpush3.bf16.msra.mxu0 %v1395_v57 }
 0x442   :  { %1397 = vmatprep.subr.bf16.mxu0 %v1546_v0 }
 0x445   :  { %1399 = vmatpush3.bf16.msra.mxu0 %v1398_v60 }
 0x446   :  { %1400 = vmatprep.subr.bf16.mxu0 %v1546_v0 }
 0x449   :  { %1402 = vmatpush3.bf16.msra.mxu0 %v1401_v63 }
 0x44a   :  { %1403 = vmatprep.subr.bf16.mxu0 %v1546_v0 }
 0x44d   :  { %1405 = vmatpush3.bf16.msra.mxu0 %v1404_v3 }
 0x44e   :  { %1406 = vmatprep.subr.bf16.mxu0 %v1546_v0 }
 0x451   :  { %1408 = vmatpush3.bf16.msra.mxu0 %v1407_v6 }
 0x452   :  { %1409 = vmatprep.subr.bf16.mxu0 %v1546_v0 }
 0x455   :  { %1411 = vmatpush3.bf16.msra.mxu0 %v1410_v14 }
 0x50b   :  { %v520_v8 = vpop.f32.mrb[4].mxu0 }
 0x50c   :  { %v521_v9 = vadd.f32 %v824_v7, %v520_v8  ;;  %v1138_v10 = vpop.f32.mrb[5].mxu0 }
 0x50e   :  { %v524_v11 = vmax.f32 %v521_v9, 0.0 }
 0x510   :  { %1172 = vmatmul.mubr.f32.vlgmr.msra.gmra.mrb[4].mxu1 %v524_v11 }
 0x511   :  { %1241 = vmatprep.mubr.msk.f32.mxu1 %vm1547_vm0, %v1548_v23  ;;  %1414 = vmatpush3.bf16.msra.mxu1 %v1413_v18  ;;  %v718_v23 = vld [vmem:[#allocation5 + $0x3b0] sm:$0xff] }
 0x512   :  { %1415 = vmatprep.subr.bf16.mxu1 %v1546_v0  ;;  %v1422_v26 = vpack.c.bf16 %v719_v25, %v718_v23 }
 0x515   :  { %1417 = vmatpush3.bf16.msra.mxu1 %v1416_v20 }
 0x516   :  { %1418 = vmatprep.subr.bf16.mxu1 %v1546_v0 }
 0x519   :  { %1420 = vmatpush3.bf16.msra.mxu1 %v1419_v24 }
 0x51a   :  { %1421 = vmatprep.subr.bf16.mxu1 %v1546_v0 }
 0x51d   :  { %1423 = vmatpush3.bf16.msra.mxu1 %v1422_v26 }
 0x51e   :  { %1424 = vmatprep.subr.bf16.mxu1 %v1546_v0 }
 0x521   :  { %1426 = vmatpush3.bf16.msra.mxu1 %v1425_v29 }
 0x522   :  { %1427 = vmatprep.subr.bf16.mxu1 %v1546_v0 }
 0x525   :  { %1429 = vmatpush3.bf16.msra.mxu1 %v1428_v32 }
 0x526   :  { %1430 = vmatprep.subr.bf16.mxu1 %v1546_v0 }
 0x529   :  { %1432 = vmatpush3.bf16.msra.mxu1 %v1431_v35 }
 0x52a   :  { %1433 = vmatprep.subr.bf16.mxu1 %v1546_v0 }
 0x52d   :  { %1435 = vmatpush3.bf16.msra.mxu1 %v1434_v43 }
 0x5e3   :  { %v613_v37 = vpop.f32.mrb[4].mxu1 }
 0x5e4   :  { %v614_v38 = vadd.f32 %v825_v36, %v613_v37  ;;  %v1173_v39 = vpop.f32.mrb[5].mxu1 }
 0x5e6   :  { %v617_v40 = vmax.f32 %v614_v38, 0.0 }
 0x5e8   :  { %1207 = vmatmul.mubr.f32.vlgmr.msra.gmra.mrb[6].mxu0 %v617_v40 }
 0x6bb   :  { %v706_v45 = vpop.f32.mrb[6].mxu0 }
 0x6bc   :  { %v707_v46 = vadd.f32 %v826_v44, %v706_v45  ;;  %v1208_v47 = vpop.f32.mrb[7].mxu0 }
 0x6be   :  { %v710_v48 = vmax.f32 %v707_v46, 0.0 }
 0x6c0   :  { %1242 = vmatmul.mubr.f32.vlgmr.msra.gmra.mrb[6].mxu1 %v710_v48 }
 0x793   :  { %v799_v0 = vpop.f32.mrb[6].mxu1 }
 0x794   :  { %v800_v50 = vadd.f32 %v827_v49, %v799_v0  ;;  %v1243_v51 = vpop.f32.mrb[7].mxu1 }
 0x796   :  { %803 = vst [vmem:[#allocation8] sm:$0xff] %v800_v50 }
 0x797   :  { %1524 = shalt.err (!%p1521_p0)
}
 0x798   :  { %s1525_s25 = scalar_lea.hbm %s1706_s3, 128 }
 0x799   :  { %p1526_p1 = scmp.ne.s32.totalorder %s1706_s3, %s1525_s25  ;;  %p1529_p2 = scmp.lt.u32.totalorder %s1525_s25, %s1706_s3 }
 0x79b   :  { %p1531_p3 = pnand %p1529_p2, %p1526_p1 }
 0x79d   :  { %1534 = shalt.err (!%p1531_p3)
}
 0x79e   :  { %813 = dma.vmem_to_hbm [thread:$0]  %s811_s21, 128, %s1706_s3, [#allocation4]  }
 0x79f   :  { %1539 = dma.done.wait [#allocation4], 128  }
 0x7a0   :  { %1540 = vsyncadd [#allocation4], 4294967168 }
 0x7a1   :  { %817 = vsyncpa [#allocation3], 1 }
 0x7a2   :  { %818 = vsyncpa [#allocation6], 1 }
 0x7a3   :  { %819 = vsyncpa [#allocation4], 1 }

</bundles_post_ra>
